<compile_context>
chip_gen: v7x
topology: tpu7x:2x2x1
jax: 0.10.0
libtpu: 0.0.40
codegen_flags: <defaults>
</compile_context>

<pallas_src>
from functools import partial

import jax
import jax.numpy as jnp
import numpy as np
from jax.experimental import pallas as pl
from jax.experimental.pallas import tpu as pltpu

CT = 8  # channel tile = sublane count of one f32 vreg tile


def _resblock_kernel(x_ref, w1_ref, b1_ref, wf_ref, bf_ref, o_ref, im_ref,
                     *, H, W, roll_sign):
    """ResBlock on a lane-dense (channels, B*H*W) layout, single grid step.

    x_ref : (CT, S)      input, channels zero-padded 4->8 on sublanes
    w1_ref: (CT, 9*CT)   conv1 weights, tap-major / channel-minor
    b1_ref: (CT, 1)      conv1 bias
    wf_ref: (CT, 10*CT)  [rezero*conv2 | residual Linear^T] fused weights
    bf_ref: (CT, 1)      rezero*b2 + b_res, zero-padded 6->8
    o_ref : (CT, S)      output, channels zero-padded 6->8
    im_ref: (10*CT, S)   VMEM scratch: rows [0, 9*CT) = im2col taps,
                         rows [9*CT, 10*CT) = the padded input x (residual)
    """
    C, S = x_ref.shape

    # ---- edge masks, hoisted & shared by both conv layers ------------------
    n = jax.lax.broadcasted_iota(jnp.int32, (1, S), 1)   # flat (b, y, x) index
    x_idx = n % W
    y_idx = (n // W) % H
    ok_x = {-1: x_idx >= 1, 1: x_idx <= W - 2}           # x+dx stays in [0, W)
    ok_y = {-1: y_idx >= 1, 1: y_idx <= H - 2}           # y+dy stays in [0, H)

    def shifted(v, s):
        # value at flat index (n + s) mod S, as a circular lane roll (XLU).
        if s % S == 0:
            return v
        return pltpu.roll(v, (-roll_sign * s) % S, axis=1)

    def build_taps(h):
        """Write the 9 replicate-padded 3x3 taps of h into im_ref[0:9*C]."""
        # dy == 0 taps first (x-clamp only).  Keep them live: they double as
        # the y-clamp fallbacks for dy = +-1, so at most ~6 (C, S) values are
        # live at once and every finished tap is retired into the scratch.
        c0 = {}
        for dx in (-1, 0, 1):
            v = shifted(h, dx)
            if dx != 0:
                v = jnp.where(ok_x[dx], v, h)            # clamp x at edge
            c0[dx] = v
            t = 3 + (dx + 1)
            im_ref[t * C:(t + 1) * C, :] = v
        for dy in (-1, 1):
            hy = shifted(h, dy * W)
            for dx in (-1, 0, 1):
                v = shifted(hy, dx)
                if dx != 0:
                    v = jnp.where(ok_x[dx], v, hy)       # clamp x at edge
                # clamp y at edge (also blocks cross-batch wrap of the roll)
                v = jnp.where(ok_y[dy], v, c0[dx])
                t = (dy + 1) * 3 + (dx + 1)
                im_ref[t * C:(t + 1) * C, :] = v

    x = x_ref[...]                                       # (C, S)
    im_ref[9 * C:10 * C, :] = x                          # residual-input rows

    # convblock1: 3x3 replicate-pad conv as one im2col matmul + bias + ReLU
    build_taps(x)
    h1 = jnp.dot(w1_ref[...], im_ref[0:9 * C, :],
                 preferred_element_type=jnp.float32) + b1_ref[...]
    h1 = jnp.maximum(h1, 0.0)                            # (C, S)

    # convblock2 (rezero folded) + residual Linear fused into a single matmul:
    # [rezero*w2 | w_res^T] @ [taps(h1); x] + (rezero*b2 + b_res)
    build_taps(h1)
    o_ref[...] = jnp.dot(wf_ref[...], im_ref[...],
                         preferred_element_type=jnp.float32) + bf_ref[...]


def _probe_roll_sign():
    """Detect pltpu.roll's shift-direction convention on this backend.

    Returns +1 if pltpu.roll matches jnp.roll (elements move toward higher
    indices), -1 otherwise; the kernel's static shift amounts adapt, so the
    im2col taps are correct under either convention.
    """
    def k(x_ref, o_ref):
        o_ref[...] = pltpu.roll(x_ref[...], 1, axis=1)

    x = jnp.arange(8 * 128, dtype=jnp.float32).reshape(8, 128)
    y = pl.pallas_call(
        k, out_shape=jax.ShapeDtypeStruct((8, 128), jnp.float32))(x)
    return 1 if float(y[0, 0]) == float(x[0, 127]) else -1


def resblock_pallas(x_nchw, params, roll_sign=1):
    """x_nchw: (B, Cin, H, W) float32 -> (B, C2, H, W) float32."""
    w1, b1, w2, b2, w_res, b_res, rz = params
    B, Cin, H, W = x_nchw.shape
    C1 = w1.shape[-1]
    C2 = w2.shape[-1]
    S = B * H * W
    assert C1 == CT and Cin <= CT and C2 <= CT and S % 128 == 0

    # Lane-dense layout: channels on sublanes (zero-padded to the 8-sublane
    # f32 tile), flattened (b, y, x) on lanes.  Tiny HBM transpose + reshapes.
    x_cs = jnp.transpose(x_nchw, (1, 0, 2, 3)).reshape(Cin, S)
    x_cs = jnp.pad(x_cs, ((0, CT - Cin), (0, 0)))

    # conv1 weights: HWIO (3,3,Cin,C1), input channels zero-padded to CT,
    # lowered to (C1, 9*CT) tap-major / channel-minor (matches scratch rows).
    w1p = jnp.pad(w1, ((0, 0), (0, 0), (0, CT - Cin), (0, 0)))
    w1f = jnp.transpose(w1p, (3, 0, 1, 2)).reshape(C1, 9 * CT)
    b1c = b1.reshape(C1, 1)

    # conv2 (rezero folded in) and the residual Linear fused into a single
    # (CT, 10*CT) weight; output channels zero-padded C2 -> CT (sliced after).
    w2f = jnp.transpose(w2, (3, 0, 1, 2)).reshape(C2, 9 * C1) * rz[0]
    wrt = jnp.pad(w_res.T, ((0, 0), (0, CT - Cin)))                 # (C2, CT)
    wf = jnp.pad(jnp.concatenate([w2f, wrt], axis=1),
                 ((0, CT - C2), (0, 0)))                            # (CT, 10*CT)
    bf = jnp.pad(b2.reshape(C2, 1) * rz[0] + b_res.reshape(C2, 1),
                 ((0, CT - C2), (0, 0)))                            # (CT, 1)

    out_cs = pl.pallas_call(
        partial(_resblock_kernel, H=H, W=W, roll_sign=roll_sign),
        out_shape=jax.ShapeDtypeStruct((CT, S), jnp.float32),
        # Whole (toy-sized) problem in one grid step; matmul N dim = B*H*W.
        # TODO(synk): at production sizes add an S-tiled grid axis (multiple of
        # 128, aligned to batch/row boundaries) marked 'parallel' so v7x's two
        # TensorCores are used, and re-derive the tile vs. its 64 MiB VMEM.
        grid=(1,),
        in_specs=[
            pl.BlockSpec((CT, S), lambda i: (0, 0)),
            pl.BlockSpec((C1, 9 * CT), lambda i: (0, 0)),
            pl.BlockSpec((C1, 1), lambda i: (0, 0)),
            pl.BlockSpec((CT, 10 * CT), lambda i: (0, 0)),
            pl.BlockSpec((CT, 1), lambda i: (0, 0)),
        ],
        out_specs=pl.BlockSpec((CT, S), lambda i: (0, 0)),
        scratch_shapes=[pltpu.VMEM((10 * CT, S), jnp.float32)],
        compiler_params=pltpu.CompilerParams(
            dimension_semantics=("arbitrary",)),
    )(x_cs, w1f, b1c, wf, bf)

    out = out_cs[:C2].reshape(C2, B, H, W)
    return jnp.transpose(out, (1, 0, 2, 3))


def resblock_reference(x_nchw, params):
    """Plain-JAX reference matching the PyTorch forward semantics."""
    w1, b1, w2, b2, w_res, b_res, rz = params
    x = jnp.transpose(x_nchw, (0, 2, 3, 1))               # NHWC

    def conv(a, w, b):
        ap = jnp.pad(a, ((0, 0), (1, 1), (1, 1), (0, 0)), mode='edge')
        y = jax.lax.conv_general_dilated(
            ap, w, window_strides=(1, 1), padding='VALID',
            dimension_numbers=('NHWC', 'HWIO', 'NHWC'))
        return y + b.reshape(1, 1, 1, -1)

    h = jax.nn.relu(conv(x, w1, b1))
    h = conv(h, w2, b2)
    res = x @ w_res + b_res.reshape(1, 1, 1, -1)
    out = h * rz[0] + res
    return jnp.transpose(out, (0, 3, 1, 2))


def make_params(key, Cin=4, C1=8, C2=6):
    ks = jax.random.split(key, 7)
    # Conv weights stored as HWIO (3, 3, Cin, Cout); Linear as (Cin, C2).
    w1 = jax.random.normal(ks[0], (3, 3, Cin, C1), jnp.float32) * 0.1
    b1 = jax.random.normal(ks[1], (1, C1), jnp.float32) * 0.1
    w2 = jax.random.normal(ks[2], (3, 3, C1, C2), jnp.float32) * 0.1
    b2 = jax.random.normal(ks[3], (1, C2), jnp.float32) * 0.1
    w_res = jax.random.normal(ks[4], (Cin, C2), jnp.float32) * 0.1
    b_res = jax.random.normal(ks[5], (1, C2), jnp.float32) * 0.1
    # PyTorch inits rezero_weight to 0; use a nonzero deterministic value so
    # the conv branch is exercised (0.5 is exact in binary, so folding it into
    # w2/b2 introduces no rounding).
    rz = jnp.array([0.5], jnp.float32)
    return (w1, b1, w2, b2, w_res, b_res, rz)


if __name__ == "__main__":
    B, Cin, H, W = 2, 4, 16, 16
    key = jax.random.PRNGKey(0)
    kx, kp = jax.random.split(key)
    x = jax.random.normal(kx, (B, Cin, H, W), jnp.float32)
    params = make_params(kp, Cin=Cin, C1=8, C2=6)

    roll_sign = _probe_roll_sign()
    out = jax.block_until_ready(resblock_pallas(x, params, roll_sign))

    ref = jax.block_until_ready(resblock_reference(x, params))
    np.testing.assert_allclose(np.asarray(out), np.asarray(ref),
                               rtol=1e-3, atol=1e-3)
    print("KERNEL_OK")
</pallas_src>

<mosaic_0001>
module attributes {stable_mosaic.version = 11 : i64} {
  func.func @k(%arg0: memref<8x128xf32, #tpu.memory_space<vmem>>, %arg1: memref<8x128xf32, #tpu.memory_space<vmem>>) attributes {dimension_semantics = [], scalar_prefetch = 0 : i64, scratch_operands = 0 : i64, tpu.core_type = #tpu.core_type<tc>} {
    %c0 = arith.constant 0 : index
    %c0_0 = arith.constant 0 : index
    %0 = vector.load %arg0[%c0, %c0_0] : memref<8x128xf32, #tpu.memory_space<vmem>>, vector<8x128xf32>
    %c1_i32 = arith.constant 1 : i32
    %1 = tpu.dynamic_rotate %0 by %c1_i32 dim 1 : vector<8x128xf32>, i32 -> vector<8x128xf32>
    %c0_1 = arith.constant 0 : index
    %c0_2 = arith.constant 0 : index
    %2 = vector.load %arg1[%c0_1, %c0_2] : memref<8x128xf32, #tpu.memory_space<vmem>>, vector<8x128xf32>
    tpu.vector_store %arg1[%c0_1, %c0_2], %1 {strides = array<i32>} : memref<8x128xf32, #tpu.memory_space<vmem>>, vector<8x128xf32>,
    return
  }
}

</mosaic_0001>

<bundles_post_ra>
// kernel: tpu_custom_call.1
= control target key start
LH: loop header
LB: loop body
LE: loop exit
PB: predicated region body
PF: predicated region fallthrough
CT: control target
= control target key end

     0   :  { %6 = vsyncpa [#allocation3], 0  ;;  %s128_s0 = inlined_call_operand.hbm [shape: f32[8,128], index: 0, kind: input, shape index: {}]   ;;  %s129_s1 = inlined_call_operand.hbm [shape: f32[8,128], index: 1, kind: output, shape index: {}]  }
   0x1   :  { %7 = vsyncpa [#allocation4], 0  ;;  %s91_s6 = smov [#allocation2]   ;;  %s43_s10 = scalar_lea.hbm %s128_s0, 128 }
   0x2   :  { %s14_s7 = sshll.u32 %s91_s6, 4  ;;  %p44_p0 = scmp.ne.s32.totalorder %s128_s0, %s43_s10  ;;  %s15_s7 = int_to_ptr.vmem [resolvable:$true] %s14_s7 }
   0x3   :  { %p47_p1 = scmp.lt.u32.totalorder %s43_s10, %s128_s0 }
   0x5   :  { %p49_p2 = pnand %p47_p1, %p44_p0 }
   0x7   :  { %52 = shalt.err (!%p49_p2)
}
   0x8   :  { %s53_s15 = scalar_lea.vmem %s15_s7, 128  ;;  %p58_p4 = scmp.lt.s32.totalorder %s15_s7, %s15_s7 }
   0x9   :  { %p54_p3 = scmp.ne.s32.totalorder %s15_s7, %s53_s15  ;;  %p59_p5 = scmp.lt.s32.totalorder %s53_s15, %s53_s15 }
   0xb   :  { %p60_p6 = por %p59_p5, %p58_p4 }
   0xd   :  { %p61_p7 = pnand %p60_p6, %p54_p3 }
   0xf   :  { %64 = shalt.err (!%p61_p7)
}
  0x10   :  { %17 = dma.hbm_to_vmem [thread:$0]  %s128_s0, 128, %s15_s7, [#allocation3]  }
  0x11   :  { %87 = dma.done.wait [#allocation3], 128  }
  0x12   :  { %88 = vsyncadd [#allocation3], 4294967168  ;;  %v21_v0 = vld [vmem:[#allocation2] sm:$0xff]  ;;  %s92_s18 = smov 1   ;;  %s93_s19 = smov [#allocation5]  }
  0x13   :  { %22 = vrot.lane.b32.xlu0 %v21_v0, %s92_s18  ;;  %s31_s20 = sshll.u32 %s93_s19, 4  ;;  %s32_s20 = int_to_ptr.vmem [resolvable:$true] %s31_s20 }
  0x14   :  { %s65_s21 = scalar_lea.vmem %s32_s20, 128  ;;  %p70_p9 = scmp.lt.s32.totalorder %s32_s20, %s32_s20 }
  0x15   :  { %p66_p8 = scmp.ne.s32.totalorder %s32_s20, %s65_s21  ;;  %p71_p10 = scmp.lt.s32.totalorder %s65_s21, %s65_s21 }
  0x17   :  { %p72_p11 = por %p71_p10, %p70_p9 }
  0x19   :  { %p73_p12 = pnand %p72_p11, %p66_p8 }
  0x85   :  { %v23_v1 = vpop.permute.xlu0 %22 }
  0x86   :  { %24 = vst [vmem:[#allocation5] sm:$0xff] %v23_v1 }
  0x87   :  { %76 = shalt.err (!%p73_p12)
}
  0x88   :  { %s77_s0 = scalar_lea.hbm %s129_s1, 128 }
  0x89   :  { %p78_p13 = scmp.ne.s32.totalorder %s129_s1, %s77_s0  ;;  %p81_p0 = scmp.lt.u32.totalorder %s77_s0, %s129_s1 }
  0x8b   :  { %p83_p1 = pnand %p81_p0, %p78_p13 }
  0x8d   :  { %86 = shalt.err (!%p83_p1)
}
  0x8e   :  { %34 = dma.vmem_to_hbm [thread:$0]  %s32_s20, 128, %s129_s1, [#allocation4]  }
  0x8f   :  { %89 = dma.done.wait [#allocation4], 128  }
  0x90   :  { %90 = vsyncadd [#allocation4], 4294967168 }
  0x91   :  { %38 = vsyncpa [#allocation3], 1 }
  0x92   :  { %39 = vsyncpa [#allocation4], 1 }

</bundles_post_ra>
